<compile_context>
chip_gen: v6e
topology: v6e:2x2x1
jax: 0.10.0
libtpu: 0.0.40
codegen_flags: <defaults>
</compile_context>

<pallas_src>
import functools

import jax
import jax.numpy as jnp
from jax.experimental import pallas as pl
from jax.experimental.pallas import tpu as pltpu

BN_EPS = 1e-5
LANE = 128


def _round_up(x, m):
    return (x + m - 1) // m * m


def fused_gin_kernel(eps_ref, a_ref, h_ref, w_ref, p_ref, o_ref, *, n_layers):
    n = a_ref.shape[0]
    inv_n = jnp.float32(1.0 / n)

    a = a_ref[...]                                          # [N, N]
    row = jax.lax.broadcasted_iota(jnp.int32, (n, n), 0)
    col = jax.lax.broadcasted_iota(jnp.int32, (n, n), 1)
    eye = (row == col).astype(jnp.float32)                  # [N, N]

    h = h_ref[...]                                          # [N, Dp] lane-dense

    for l in range(n_layers):                               # unrolled (L static)
        # dgl GINConv (sum pooling, learn_eps): (1+eps)*h + sum_nbr h,
        # folded as (A + (1+eps)*I) @ h  -> single MXU matmul.
        a_eps = a + (1.0 + eps_ref[l]) * eye
        z = jnp.dot(a_eps, h, preferred_element_type=jnp.float32)

        p = p_ref[l]                                        # [8, Dp] packed params
        bias = p[0:1, :]
        gammas = (p[1:2, :], p[3:4, :])
        betas = (p[2:3, :], p[4:5, :])

        # MLP with num_mlp_layers == 1 -> single Linear
        y = jnp.dot(z, w_ref[l], preferred_element_type=jnp.float32) + bias

        # ApplyNodeFunc BN+ReLU, then GIN outer BN+ReLU (training-mode stats)
        for g, beta in zip(gammas, betas):
            s1 = jnp.sum(y, axis=0, keepdims=True)          # [1, Dp]
            s2 = jnp.sum(y * y, axis=0, keepdims=True)      # single-pass stats
            mean = s1 * inv_n
            var = s2 * inv_n - mean * mean                  # biased variance
            scale = jax.lax.rsqrt(var + BN_EPS) * g         # [1, Dp] row (EUP)
            y = jnp.maximum((y - mean) * scale + beta, 0.0)

        h = y

    o_ref[...] = h


def _pack_params(params, d_pad):
    """Stack per-layer weights [L,Dp,Dp], pack bias/BN params [L,8,Dp], eps [L]."""
    w_stack, p_stack, eps_stack = [], [], []
    for prm in params:
        din, dout = prm["w"].shape
        w_pad = jnp.zeros((d_pad, d_pad), jnp.float32).at[:din, :dout].set(prm["w"])
        pk = jnp.zeros((8, d_pad), jnp.float32)
        pk = pk.at[0, :dout].set(prm["b"][0])
        pk = pk.at[1, :dout].set(prm["g1"][0])
        pk = pk.at[2, :dout].set(prm["b1"][0])
        pk = pk.at[3, :dout].set(prm["g2"][0])
        pk = pk.at[4, :dout].set(prm["b2"][0])
        w_stack.append(w_pad)
        p_stack.append(pk)
        eps_stack.append(prm["eps"].reshape(()))
    return jnp.stack(w_stack), jnp.stack(p_stack), jnp.stack(eps_stack)


def contextpred_gin_forward(adj, features, params):
    """contextpred_GIN.forward(features) == Encoder == GIN over n_layers,
    all layers fused into a single Pallas call."""
    n, in_feats = features.shape
    n_hidden = params[0]["w"].shape[1]
    n_layers = len(params)
    d_pad = _round_up(max(in_feats, n_hidden), LANE)

    h0 = jnp.zeros((n, d_pad), jnp.float32).at[:, :in_feats].set(features)
    w, p, eps = _pack_params(params, d_pad)

    vmem = pl.BlockSpec(memory_space=pltpu.MemorySpace.VMEM)
    smem = pl.BlockSpec(memory_space=pltpu.MemorySpace.SMEM)
    out = pl.pallas_call(
        functools.partial(fused_gin_kernel, n_layers=n_layers),
        out_shape=jax.ShapeDtypeStruct((n, d_pad), jnp.float32),
        in_specs=[smem, vmem, vmem, vmem, vmem],
        out_specs=vmem,
    )(eps, adj, h0, w, p)
    return out[:, :n_hidden]


def init_params(key, in_feats, n_hidden, n_layers):
    """Deterministic synthetic parameters (shapes match the PyTorch module)."""
    params = []
    for i in range(n_layers):
        din = in_feats if i == 0 else n_hidden
        key, k1, k2, k3, k4, k5, k6 = jax.random.split(key, 7)
        params.append(dict(
            eps=jnp.zeros((1,), jnp.float32),                                   # GINConv init_eps=0
            w=jax.random.normal(k1, (din, n_hidden), jnp.float32) / jnp.sqrt(din),
            b=0.01 * jax.random.normal(k2, (1, n_hidden), jnp.float32),
            g1=1.0 + 0.1 * jax.random.normal(k3, (1, n_hidden), jnp.float32),
            b1=0.1 * jax.random.normal(k4, (1, n_hidden), jnp.float32),
            g2=1.0 + 0.1 * jax.random.normal(k5, (1, n_hidden), jnp.float32),
            b2=0.1 * jax.random.normal(k6, (1, n_hidden), jnp.float32),
        ))
    return params


def reference_forward(adj, features, params):
    """Pure-JAX reference (same math, no Pallas) for a correctness check."""
    h = features
    for p in params:
        z = (1.0 + p["eps"][0]) * h + adj @ h
        y = z @ p["w"] + p["b"]
        for g, b in ((p["g1"], p["b1"]), (p["g2"], p["b2"])):
            m = jnp.mean(y, axis=0, keepdims=True)
            v = jnp.mean((y - m) ** 2, axis=0, keepdims=True)
            y = jnp.maximum((y - m) * jax.lax.rsqrt(v + BN_EPS) * g + b, 0.0)
        h = y
    return h


if __name__ == "__main__":
    N = 64          # number of nodes in the graph g
    IN_FEATS = 32
    N_HIDDEN = 32
    N_LAYERS = 2    # n_layers (> args.l1)

    key = jax.random.PRNGKey(0)
    k_adj, k_feat, k_param = jax.random.split(key, 3)

    # deterministic synthetic graph: symmetric adjacency, no self loops
    adj = (jax.random.uniform(k_adj, (N, N)) < 0.1).astype(jnp.float32)
    adj = jnp.maximum(adj, adj.T) * (1.0 - jnp.eye(N, dtype=jnp.float32))

    features = jax.random.normal(k_feat, (N, IN_FEATS), jnp.float32)
    params = init_params(k_param, IN_FEATS, N_HIDDEN, N_LAYERS)

    out = contextpred_gin_forward(adj, features, params)
    out = jax.block_until_ready(out)

    ref = reference_forward(adj, features, params)
    assert out.shape == (N, N_HIDDEN)
    assert jnp.allclose(out, ref, atol=2e-2, rtol=2e-2)

    print("KERNEL_OK")
</pallas_src>

<mosaic_0001>
module attributes {stable_mosaic.version = 11 : i64} {
  func.func @fused_gin_kernel(%arg0: memref<2xf32, #tpu.memory_space<smem>>, %arg1: memref<64x64xf32, #tpu.memory_space<vmem>>, %arg2: memref<64x128xf32, #tpu.memory_space<vmem>>, %arg3: memref<2x128x128xf32, #tpu.memory_space<vmem>>, %arg4: memref<2x8x128xf32, #tpu.memory_space<vmem>>, %arg5: memref<64x128xf32, #tpu.memory_space<vmem>>) attributes {dimension_semantics = [], scalar_prefetch = 0 : i64, scratch_operands = 0 : i64, tpu.core_type = #tpu.core_type<tc>} {
    %c0 = arith.constant 0 : index
    %c0_0 = arith.constant 0 : index
    %0 = vector.load %arg1[%c0, %c0_0] : memref<64x64xf32, #tpu.memory_space<vmem>>, vector<64x64xf32>
    %1 = tpu.iota {dimensions = array<i32: 0>} : vector<64x64xi32>
    %2 = tpu.iota {dimensions = array<i32: 1>} : vector<64x64xi32>
    %3 = arith.cmpi eq, %1, %2 : vector<64x64xi32>
    %4 = arith.extui %3 : vector<64x64xi1> to vector<64x64xi32>
    %5 = arith.sitofp %4 : vector<64x64xi32> to vector<64x64xf32>
    %c0_1 = arith.constant 0 : index
    %c0_2 = arith.constant 0 : index
    %6 = vector.load %arg2[%c0_1, %c0_2] : memref<64x128xf32, #tpu.memory_space<vmem>>, vector<64x128xf32>
    %c0_3 = arith.constant 0 : index
    %7 = memref.load %arg0[%c0_3] : memref<2xf32, #tpu.memory_space<smem>>
    %cst = arith.constant 1.000000e+00 : f32
    %8 = arith.addf %cst, %7 : f32
    %9 = vector.broadcast %8 : f32 to vector<64x64xf32>
    %10 = arith.mulf %9, %5 : vector<64x64xf32>
    %11 = arith.addf %0, %10 : vector<64x64xf32>
    %cst_4 = arith.constant dense<0.000000e+00> : vector<64x128xf32>
    %12 = tpu.matmul %11, %6, %cst_4 {dimension_numbers = #tpu.dot_dimension_numbers<[1], [0], [0], [1], [0, 0, 1, 1], [], []>} : vector<64x64xf32>, vector<64x128xf32>, vector<64x128xf32> -> vector<64x128xf32>
    %c0_5 = arith.constant 0 : index
    %c0_6 = arith.constant 0 : index
    %c0_7 = arith.constant 0 : index
    %13 = vector.load %arg4[%c0_5, %c0_6, %c0_7] : memref<2x8x128xf32, #tpu.memory_space<vmem>>, vector<1x8x128xf32>
    %14 = vector.shape_cast %13 : vector<1x8x128xf32> to vector<8x128xf32>
    %15 = vector.extract_strided_slice %14 {offsets = [0, 0], sizes = [1, 128], strides = [1, 1]} : vector<8x128xf32> to vector<1x128xf32>
    %16 = vector.extract_strided_slice %14 {offsets = [1, 0], sizes = [1, 128], strides = [1, 1]} : vector<8x128xf32> to vector<1x128xf32>
    %17 = vector.extract_strided_slice %14 {offsets = [3, 0], sizes = [1, 128], strides = [1, 1]} : vector<8x128xf32> to vector<1x128xf32>
    %18 = vector.extract_strided_slice %14 {offsets = [2, 0], sizes = [1, 128], strides = [1, 1]} : vector<8x128xf32> to vector<1x128xf32>
    %19 = vector.extract_strided_slice %14 {offsets = [4, 0], sizes = [1, 128], strides = [1, 1]} : vector<8x128xf32> to vector<1x128xf32>
    %c0_8 = arith.constant 0 : index
    %c0_9 = arith.constant 0 : index
    %c0_10 = arith.constant 0 : index
    %20 = vector.load %arg3[%c0_8, %c0_9, %c0_10] : memref<2x128x128xf32, #tpu.memory_space<vmem>>, vector<1x128x128xf32>
    %21 = vector.shape_cast %20 : vector<1x128x128xf32> to vector<128x128xf32>
    %cst_11 = arith.constant dense<0.000000e+00> : vector<64x128xf32>
    %22 = tpu.matmul %12, %21, %cst_11 {dimension_numbers = #tpu.dot_dimension_numbers<[1], [0], [0], [1], [0, 0, 1, 1], [], []>} : vector<64x128xf32>, vector<128x128xf32>, vector<64x128xf32> -> vector<64x128xf32>
    %23 = vector.broadcast %15 : vector<1x128xf32> to vector<64x128xf32>
    %24 = arith.addf %22, %23 : vector<64x128xf32>
    %cst_12 = arith.constant dense<0.000000e+00> : vector<128xf32>
    %25 = vector.multi_reduction <add>, %24, %cst_12 [0] : vector<64x128xf32> to vector<128xf32>
    %26 = vector.shape_cast %25 : vector<128xf32> to vector<1x128xf32>
    %27 = arith.mulf %24, %24 : vector<64x128xf32>
    %cst_13 = arith.constant dense<0.000000e+00> : vector<128xf32>
    %28 = vector.multi_reduction <add>, %27, %cst_13 [0] : vector<64x128xf32> to vector<128xf32>
    %29 = vector.shape_cast %28 : vector<128xf32> to vector<1x128xf32>
    %cst_14 = arith.constant 1.562500e-02 : f32
    %30 = vector.broadcast %cst_14 : f32 to vector<1x128xf32>
    %31 = arith.mulf %26, %30 : vector<1x128xf32>
    %cst_15 = arith.constant 1.562500e-02 : f32
    %32 = vector.broadcast %cst_15 : f32 to vector<1x128xf32>
    %33 = arith.mulf %29, %32 : vector<1x128xf32>
    %34 = arith.mulf %31, %31 : vector<1x128xf32>
    %35 = arith.subf %33, %34 : vector<1x128xf32>
    %cst_16 = arith.constant 9.99999974E-6 : f32
    %36 = vector.broadcast %cst_16 : f32 to vector<1x128xf32>
    %37 = arith.addf %35, %36 : vector<1x128xf32>
    %38 = math.rsqrt %37 : vector<1x128xf32>
    %39 = arith.mulf %38, %16 : vector<1x128xf32>
    %40 = vector.broadcast %31 : vector<1x128xf32> to vector<64x128xf32>
    %41 = arith.subf %24, %40 : vector<64x128xf32>
    %42 = vector.broadcast %39 : vector<1x128xf32> to vector<64x128xf32>
    %43 = arith.mulf %41, %42 : vector<64x128xf32>
    %44 = vector.broadcast %18 : vector<1x128xf32> to vector<64x128xf32>
    %45 = arith.addf %43, %44 : vector<64x128xf32>
    %cst_17 = arith.constant 0.000000e+00 : f32
    %46 = vector.broadcast %cst_17 : f32 to vector<64x128xf32>
    %47 = arith.maximumf %45, %46 : vector<64x128xf32>
    %cst_18 = arith.constant dense<0.000000e+00> : vector<128xf32>
    %48 = vector.multi_reduction <add>, %47, %cst_18 [0] : vector<64x128xf32> to vector<128xf32>
    %49 = vector.shape_cast %48 : vector<128xf32> to vector<1x128xf32>
    %50 = arith.mulf %47, %47 : vector<64x128xf32>
    %cst_19 = arith.constant dense<0.000000e+00> : vector<128xf32>
    %51 = vector.multi_reduction <add>, %50, %cst_19 [0] : vector<64x128xf32> to vector<128xf32>
    %52 = vector.shape_cast %51 : vector<128xf32> to vector<1x128xf32>
    %cst_20 = arith.constant 1.562500e-02 : f32
    %53 = vector.broadcast %cst_20 : f32 to vector<1x128xf32>
    %54 = arith.mulf %49, %53 : vector<1x128xf32>
    %cst_21 = arith.constant 1.562500e-02 : f32
    %55 = vector.broadcast %cst_21 : f32 to vector<1x128xf32>
    %56 = arith.mulf %52, %55 : vector<1x128xf32>
    %57 = arith.mulf %54, %54 : vector<1x128xf32>
    %58 = arith.subf %56, %57 : vector<1x128xf32>
    %cst_22 = arith.constant 9.99999974E-6 : f32
    %59 = vector.broadcast %cst_22 : f32 to vector<1x128xf32>
    %60 = arith.addf %58, %59 : vector<1x128xf32>
    %61 = math.rsqrt %60 : vector<1x128xf32>
    %62 = arith.mulf %61, %17 : vector<1x128xf32>
    %63 = vector.broadcast %54 : vector<1x128xf32> to vector<64x128xf32>
    %64 = arith.subf %47, %63 : vector<64x128xf32>
    %65 = vector.broadcast %62 : vector<1x128xf32> to vector<64x128xf32>
    %66 = arith.mulf %64, %65 : vector<64x128xf32>
    %67 = vector.broadcast %19 : vector<1x128xf32> to vector<64x128xf32>
    %68 = arith.addf %66, %67 : vector<64x128xf32>
    %cst_23 = arith.constant 0.000000e+00 : f32
    %69 = vector.broadcast %cst_23 : f32 to vector<64x128xf32>
    %70 = arith.maximumf %68, %69 : vector<64x128xf32>
    %c1 = arith.constant 1 : index
    %71 = memref.load %arg0[%c1] : memref<2xf32, #tpu.memory_space<smem>>
    %cst_24 = arith.constant 1.000000e+00 : f32
    %72 = arith.addf %cst_24, %71 : f32
    %73 = vector.broadcast %72 : f32 to vector<64x64xf32>
    %74 = arith.mulf %73, %5 : vector<64x64xf32>
    %75 = arith.addf %0, %74 : vector<64x64xf32>
    %cst_25 = arith.constant dense<0.000000e+00> : vector<64x128xf32>
    %76 = tpu.matmul %75, %70, %cst_25 {dimension_numbers = #tpu.dot_dimension_numbers<[1], [0], [0], [1], [0, 0, 1, 1], [], []>} : vector<64x64xf32>, vector<64x128xf32>, vector<64x128xf32> -> vector<64x128xf32>
    %c1_26 = arith.constant 1 : index
    %c0_27 = arith.constant 0 : index
    %c0_28 = arith.constant 0 : index
    %77 = vector.load %arg4[%c1_26, %c0_27, %c0_28] : memref<2x8x128xf32, #tpu.memory_space<vmem>>, vector<1x8x128xf32>
    %78 = vector.shape_cast %77 : vector<1x8x128xf32> to vector<8x128xf32>
    %79 = vector.extract_strided_slice %78 {offsets = [0, 0], sizes = [1, 128], strides = [1, 1]} : vector<8x128xf32> to vector<1x128xf32>
    %80 = vector.extract_strided_slice %78 {offsets = [1, 0], sizes = [1, 128], strides = [1, 1]} : vector<8x128xf32> to vector<1x128xf32>
    %81 = vector.extract_strided_slice %78 {offsets = [3, 0], sizes = [1, 128], strides = [1, 1]} : vector<8x128xf32> to vector<1x128xf32>
    %82 = vector.extract_strided_slice %78 {offsets = [2, 0], sizes = [1, 128], strides = [1, 1]} : vector<8x128xf32> to vector<1x128xf32>
    %83 = vector.extract_strided_slice %78 {offsets = [4, 0], sizes = [1, 128], strides = [1, 1]} : vector<8x128xf32> to vector<1x128xf32>
    %c1_29 = arith.constant 1 : index
    %c0_30 = arith.constant 0 : index
    %c0_31 = arith.constant 0 : index
    %84 = vector.load %arg3[%c1_29, %c0_30, %c0_31] : memref<2x128x128xf32, #tpu.memory_space<vmem>>, vector<1x128x128xf32>
    %85 = vector.shape_cast %84 : vector<1x128x128xf32> to vector<128x128xf32>
    %cst_32 = arith.constant dense<0.000000e+00> : vector<64x128xf32>
    %86 = tpu.matmul %76, %85, %cst_32 {dimension_numbers = #tpu.dot_dimension_numbers<[1], [0], [0], [1], [0, 0, 1, 1], [], []>} : vector<64x128xf32>, vector<128x128xf32>, vector<64x128xf32> -> vector<64x128xf32>
    %87 = vector.broadcast %79 : vector<1x128xf32> to vector<64x128xf32>
    %88 = arith.addf %86, %87 : vector<64x128xf32>
    %cst_33 = arith.constant dense<0.000000e+00> : vector<128xf32>
    %89 = vector.multi_reduction <add>, %88, %cst_33 [0] : vector<64x128xf32> to vector<128xf32>
    %90 = vector.shape_cast %89 : vector<128xf32> to vector<1x128xf32>
    %91 = arith.mulf %88, %88 : vector<64x128xf32>
    %cst_34 = arith.constant dense<0.000000e+00> : vector<128xf32>
    %92 = vector.multi_reduction <add>, %91, %cst_34 [0] : vector<64x128xf32> to vector<128xf32>
    %93 = vector.shape_cast %92 : vector<128xf32> to vector<1x128xf32>
    %cst_35 = arith.constant 1.562500e-02 : f32
    %94 = vector.broadcast %cst_35 : f32 to vector<1x128xf32>
    %95 = arith.mulf %90, %94 : vector<1x128xf32>
    %cst_36 = arith.constant 1.562500e-02 : f32
    %96 = vector.broadcast %cst_36 : f32 to vector<1x128xf32>
    %97 = arith.mulf %93, %96 : vector<1x128xf32>
    %98 = arith.mulf %95, %95 : vector<1x128xf32>
    %99 = arith.subf %97, %98 : vector<1x128xf32>
    %cst_37 = arith.constant 9.99999974E-6 : f32
    %100 = vector.broadcast %cst_37 : f32 to vector<1x128xf32>
    %101 = arith.addf %99, %100 : vector<1x128xf32>
    %102 = math.rsqrt %101 : vector<1x128xf32>
    %103 = arith.mulf %102, %80 : vector<1x128xf32>
    %104 = vector.broadcast %95 : vector<1x128xf32> to vector<64x128xf32>
    %105 = arith.subf %88, %104 : vector<64x128xf32>
    %106 = vector.broadcast %103 : vector<1x128xf32> to vector<64x128xf32>
    %107 = arith.mulf %105, %106 : vector<64x128xf32>
    %108 = vector.broadcast %82 : vector<1x128xf32> to vector<64x128xf32>
    %109 = arith.addf %107, %108 : vector<64x128xf32>
    %cst_38 = arith.constant 0.000000e+00 : f32
    %110 = vector.broadcast %cst_38 : f32 to vector<64x128xf32>
    %111 = arith.maximumf %109, %110 : vector<64x128xf32>
    %cst_39 = arith.constant dense<0.000000e+00> : vector<128xf32>
    %112 = vector.multi_reduction <add>, %111, %cst_39 [0] : vector<64x128xf32> to vector<128xf32>
    %113 = vector.shape_cast %112 : vector<128xf32> to vector<1x128xf32>
    %114 = arith.mulf %111, %111 : vector<64x128xf32>
    %cst_40 = arith.constant dense<0.000000e+00> : vector<128xf32>
    %115 = vector.multi_reduction <add>, %114, %cst_40 [0] : vector<64x128xf32> to vector<128xf32>
    %116 = vector.shape_cast %115 : vector<128xf32> to vector<1x128xf32>
    %cst_41 = arith.constant 1.562500e-02 : f32
    %117 = vector.broadcast %cst_41 : f32 to vector<1x128xf32>
    %118 = arith.mulf %113, %117 : vector<1x128xf32>
    %cst_42 = arith.constant 1.562500e-02 : f32
    %119 = vector.broadcast %cst_42 : f32 to vector<1x128xf32>
    %120 = arith.mulf %116, %119 : vector<1x128xf32>
    %121 = arith.mulf %118, %118 : vector<1x128xf32>
    %122 = arith.subf %120, %121 : vector<1x128xf32>
    %cst_43 = arith.constant 9.99999974E-6 : f32
    %123 = vector.broadcast %cst_43 : f32 to vector<1x128xf32>
    %124 = arith.addf %122, %123 : vector<1x128xf32>
    %125 = math.rsqrt %124 : vector<1x128xf32>
    %126 = arith.mulf %125, %81 : vector<1x128xf32>
    %127 = vector.broadcast %118 : vector<1x128xf32> to vector<64x128xf32>
    %128 = arith.subf %111, %127 : vector<64x128xf32>
    %129 = vector.broadcast %126 : vector<1x128xf32> to vector<64x128xf32>
    %130 = arith.mulf %128, %129 : vector<64x128xf32>
    %131 = vector.broadcast %83 : vector<1x128xf32> to vector<64x128xf32>
    %132 = arith.addf %130, %131 : vector<64x128xf32>
    %cst_44 = arith.constant 0.000000e+00 : f32
    %133 = vector.broadcast %cst_44 : f32 to vector<64x128xf32>
    %134 = arith.maximumf %132, %133 : vector<64x128xf32>
    %c0_45 = arith.constant 0 : index
    %c0_46 = arith.constant 0 : index
    %135 = vector.load %arg5[%c0_45, %c0_46] : memref<64x128xf32, #tpu.memory_space<vmem>>, vector<64x128xf32>
    tpu.vector_store %arg5[%c0_45, %c0_46], %134 {strides = array<i32>} : memref<64x128xf32, #tpu.memory_space<vmem>>, vector<64x128xf32>,
    return
  }
}

</mosaic_0001>

<bundles_post_ra>
// kernel: tpu_custom_call.1
= control target key start
LH: loop header
LB: loop body
LE: loop exit
PB: predicated region body
PF: predicated region fallthrough
CT: control target
= control target key end

     0   :  { %10 = vsyncpa [#allocation5], 0  ;;  %s1735_s0 = inlined_call_operand.hbm [shape: f32[2], index: 0, kind: input, shape index: {}]   ;;  %s1736_s1 = inlined_call_operand.hbm [shape: f32[64,64], index: 1, kind: input, shape index: {}]   ;;  %s1737_s2 = inlined_call_operand.hbm [shape: f32[64,128], index: 2, kind: input, shape index: {}]   ;;  %s1738_s3 = inlined_call_operand.hbm [shape: f32[2,128,128], index: 3, kind: input, shape index: {}]   ;;  %s1739_s4 = inlined_call_operand.hbm [shape: f32[2,8,128], index: 4, kind: input, shape index: {}]   ;;  %s1740_s5 = inlined_call_operand.hbm [shape: f32[64,128], index: 5, kind: output, shape index: {}]  }
   0x1   :  { %11 = vsyncpa [#allocation3], 0 }
   0x2   :  { %12 = vsyncpa [#allocation8], 0 }
   0x3   :  { %13 = vsyncpa [#allocation11], 0 }
   0x4   :  { %14 = vsyncpa [#allocation4], 0  ;;  %s1425_s18 = smov [#allocation7]   ;;  %s1426_s20 = smov [#allocation6]  }
   0x5   :  { %s40_s19 = sshll.u32 %s1425_s18, 4  ;;  %s28_s21 = sshll.u32 %s1426_s20, 4  ;;  %s41_s19 = int_to_ptr.vmem [resolvable:$true] %s40_s19  ;;  %s29_s21 = int_to_ptr.vmem [resolvable:$true] %s28_s21 }
   0x6   :  { %s1315_s22 = scalar_lea.vmem %s41_s19, 1024  ;;  %p1320_p1 = scmp.lt.s32.totalorder %s41_s19, %s41_s19 }
   0x7   :  { %p1316_p0 = scmp.ne.s32.totalorder %s41_s19, %s1315_s22  ;;  %p1321_p2 = scmp.lt.s32.totalorder %s1315_s22, %s1315_s22 }
   0x9   :  { %p1322_p3 = por %p1321_p2, %p1320_p1 }
   0xb   :  { %p1323_p4 = pnand %p1322_p3, %p1316_p0 }
   0xd   :  { %1326 = shalt.err (!%p1323_p4)
}
   0xe   :  { %s1427_s23 = smov 128   ;;  %s1428_s24 = smov 8  }
   0xf   :  { %46 = dma.hbm_to_vmem [thread:$0]  %s1737_s2, 1024, %s41_s19, [#allocation8], %s1427_s23, %s1427_s23, %s1428_s24  }
  0x10   :  { %s1429_s27 = smov [#allocation2]   ;;  %s1343_s30 = scalar_lea.vmem %s29_s21, 1024 }
  0x11   :  { %22 = dma.hbm_to_smem %s1735_s0, 16, %s1429_s27, [#allocation5]  }
  0x12   :  { %p1344_p5 = scmp.ne.s32.totalorder %s29_s21, %s1343_s30  ;;  %p1348_p6 = scmp.lt.s32.totalorder %s29_s21, %s29_s21 }
  0x13   :  { %p1349_p7 = scmp.lt.s32.totalorder %s1343_s30, %s1343_s30 }
  0x15   :  { %p1350_p8 = por %p1349_p7, %p1348_p6 }
  0x17   :  { %p1351_p9 = pnand %p1350_p8, %p1344_p5 }
  0x19   :  { %1354 = shalt.err (!%p1351_p9)
}
  0x1a   :  { %34 = dma.hbm_to_vmem [thread:$0]  %s1736_s1, 1024, %s29_s21, [#allocation3], %s1427_s23, %s1427_s23, %s1428_s24  }
  0x1b   :  { %s1430_s2 = smov [#allocation9]   ;;  %s1431_s9 = smov [#allocation10]  }
  0x1c   :  { %s52_s8 = sshll.u32 %s1430_s2, 4  ;;  %s64_s0 = sshll.u32 %s1431_s9, 4  ;;  %s53_s8 = int_to_ptr.vmem [resolvable:$true] %s52_s8  ;;  %s65_s0 = int_to_ptr.vmem [resolvable:$true] %s64_s0 }
  0x1d   :  { %s1363_s10 = scalar_lea.vmem %s53_s8, 4096  ;;  %p1368_p11 = scmp.lt.s32.totalorder %s53_s8, %s53_s8 }
  0x1e   :  { %p1364_p10 = scmp.ne.s32.totalorder %s53_s8, %s1363_s10  ;;  %p1369_p12 = scmp.lt.s32.totalorder %s1363_s10, %s1363_s10 }
  0x20   :  { %p1370_p13 = por %p1369_p12, %p1368_p11 }
  0x22   :  { %p1371_p0 = pnand %p1370_p13, %p1364_p10 }
  0x24   :  { %1374 = shalt.err (!%p1371_p0)
}
  0x25   :  { %58 = dma.hbm_to_vmem [thread:$0]  %s1738_s3, 4096, %s53_s8, [#allocation8], %s1427_s23, %s1427_s23, %s1428_s24  }
  0x26   :  { %s1383_s1 = scalar_lea.vmem %s65_s0, 256  ;;  %p1388_p2 = scmp.lt.s32.totalorder %s65_s0, %s65_s0 }
  0x27   :  { %p1384_p1 = scmp.ne.s32.totalorder %s65_s0, %s1383_s1  ;;  %p1389_p3 = scmp.lt.s32.totalorder %s1383_s1, %s1383_s1 }
  0x29   :  { %p1390_p4 = por %p1389_p3, %p1388_p2 }
  0x2b   :  { %p1391_p5 = pnand %p1390_p4, %p1384_p1 }
  0x2d   :  { %1394 = shalt.err (!%p1391_p5)
}
  0x2e   :  { %70 = dma.hbm_to_vmem [thread:$0]  %s1739_s4, 256, %s65_s0, [#allocation11], %s1427_s23, %s1427_s23, %s1428_s24  }
  0x2f   :  { %1415 = dma.done.wait [#allocation5], 16  }
  0x30   :  { %1416 = vsyncadd [#allocation5], 4294967280 }
  0x31   :  { %1417 = dma.done.wait [#allocation3], 1024  }
  0x32   :  { %1418 = vsyncadd [#allocation3], 4294966272 }
  0x33   :  { %1419 = dma.done.wait [#allocation8], 5120  }
  0x34   :  { %1420 = vsyncadd [#allocation8], 4294962176 }
  0x35   :  { %1421 = dma.done.wait [#allocation11], 256  }
  0x36   :  { %1422 = vsyncadd [#allocation11], 4294967040 }
  0x37   :  { %86 = sfence }
  0x38   :  { %v137_v0 = vld [vmem:[#allocation7 + $0x38] sm:$0xff]  ;;  %v136_v1 = vld [vmem:[#allocation7 + $0x30] sm:$0xff]  ;;  %v95_v2 = vlaneseq  ;;  %s1491_s3 = sld [smem:[#allocation2]]  ;;  %v135_v3 = vld [vmem:[#allocation7 + $0x28] sm:$0xff]  ;;  %v1432_v12 = vmov 0.0   ;;  %vm157_vm5 = vcmask 523264  }
  0x39   :  { %1146 = vmatprep.subr.mxu1 %v137_v0  ;;  %v134_v6 = vld [vmem:[#allocation7 + $0x20] sm:$0xff]  ;;  %v133_v11 = vld [vmem:[#allocation7 + $0x18] sm:$0xff]  ;;  %v132_v17 = vld [vmem:[#allocation7 + $0x10] sm:$0xff]  ;;  %s1057_s15 = sld [smem:[#allocation2 + $0x1]]  ;;  %s1433_s17 = smov [#allocation12]  }
  0x3a   :  { %1147 = vmatpush3.msra.mxu1 %v137_v0  ;;  %v1493_v4 = vshrl.u32 %v95_v2, 7  ;;  %v1495_v5 = vand.u32 127, %v95_v2  ;;  %v1514_v18 = vld [vmem:[#allocation6] sm:$0xff]  ;;  %v131_v23 = vld [vmem:[#allocation7 + $0x8] sm:$0xff]  ;;  %v1528_v28 = vld [vmem:[#allocation6 + $0x10] sm:$0xff]  ;;  %s1026_s18 = sshll.u32 %s1433_s17, 4  ;;  %s1027_s18 = int_to_ptr.vmem [resolvable:$true] %s1026_s18 }
  0x3b   :  { %1148 = vmatprep.subr.mxu1 %v136_v1  ;;  %v1520_v24 = vld [vmem:[#allocation6 + $0x8] sm:$0xff]  ;;  %v130_v31 = vld [vmem:[#allocation7] sm:$0xff]  ;;  %v1539_v35 = vld [vmem:[#allocation6 + $0x18] sm:$0xff]  ;;  %s1395_s19 = scalar_lea.vmem %s1027_s18, 1024  ;;  %p1400_p7 = scmp.lt.s32.totalorder %s1027_s18, %s1027_s18 }
  0x3c   :  { %1149 = vmatpush3.msra.mxu1 %v136_v1  ;;  %vm106_vm0 = vcmp.eq.s32.totalorder %v1493_v4, %v1495_v5  ;;  %v97_v7 = vadd.s32 8, %v1493_v4  ;;  %v98_v8 = vadd.s32 16, %v1493_v4  ;;  %v99_v9 = vadd.s32 24, %v1493_v4  ;;  %v303_v38 = vld [vmem:[#allocation9 + $0x78] sm:$0xff]  ;;  %v1544_v39 = vld [vmem:[#allocation6 + $0x20] sm:$0xff]  ;;  %v302_v41 = vld [vmem:[#allocation9 + $0x70] sm:$0xff]  ;;  %p1396_p6 = scmp.ne.s32.totalorder %s1027_s18, %s1395_s19  ;;  %p1401_p8 = scmp.lt.s32.totalorder %s1395_s19, %s1395_s19 }
  0x3d   :  { %1150 = vmatprep.subr.mxu1 %v135_v3  ;;  %v100_v10 = vadd.s32 32, %v1493_v4  ;;  %v1503_v13 = vsel %vm106_vm0, 1.0, %v1432_v12  ;;  %v101_v16 = vadd.s32 40, %v1493_v4  ;;  %v102_v20 = vadd.s32 48, %v1493_v4  ;;  %v1554_v45 = vld [vmem:[#allocation6 + $0x28] sm:$0xff]  ;;  %v1559_v49 = vld [vmem:[#allocation6 + $0x30] sm:$0xff] }
  0x3e   :  { %1151 = vmatpush3.msra.mxu1 %v135_v3  ;;  %s139_s4 = sadd.f32 1.0, %s1491_s3  ;;  %vm107_vm1 = vcmp.eq.s32.totalorder %v97_v7, %v1495_v5  ;;  %vm108_vm2 = vcmp.eq.s32.totalorder %v98_v8, %v1495_v5  ;;  %vm109_vm3 = vcmp.eq.s32.totalorder %v99_v9, %v1495_v5  ;;  %v103_v30 = vadd.s32 56, %v1493_v4  ;;  %v301_v48 = vld [vmem:[#allocation9 + $0x68] sm:$0xff]  ;;  %v300_v50 = vld [vmem:[#allocation9 + $0x60] sm:$0xff]  ;;  %v1566_v54 = vld [vmem:[#allocation6 + $0x38] sm:$0xff]  ;;  %p1402_p9 = por %p1401_p8, %p1400_p7 }
  0x3f   :  { %1152 = vmatprep.subr.mxu1 %v134_v6  ;;  %v1508_v14 = vsel %vm107_vm1, 1.0, %v1432_v12  ;;  %v1510_v15 = vsel %vm108_vm2, 1.0, %v1432_v12  ;;  %vm110_vm4 = vcmp.eq.s32.totalorder %v100_v10, %v1495_v5  ;;  %v1525_v26 = vsel %vm109_vm3, 1.0, %v1432_v12  ;;  %v299_v55 = vld [vmem:[#allocation9 + $0x58] sm:$0xff]  ;;  %v298_v56 = vld [vmem:[#allocation9 + $0x50] sm:$0xff]  ;;  %v297_v58 = vld [vmem:[#allocation9 + $0x48] sm:$0xff] }
  0x40   :  { %1153 = vmatpush3.msra.mxu1 %v134_v6  ;;  %v140_v19 = vstv %s139_s4  ;;  %v1530_v29 = vsel %vm110_vm4, 1.0, %v1432_v12  ;;  %vm111_vm6 = vcmp.eq.s32.totalorder %v101_v16, %v1495_v5  ;;  %vm112_vm7 = vcmp.eq.s32.totalorder %v102_v20, %v1495_v5  ;;  %v296_v59 = vld [vmem:[#allocation9 + $0x40] sm:$0xff]  ;;  %v295_v60 = vld [vmem:[#allocation9 + $0x38] sm:$0xff]  ;;  %v294_v61 = vld [vmem:[#allocation9 + $0x30] sm:$0xff]  ;;  %s576_s16 = sadd.f32 1.0, %s1057_s15  ;;  %p1403_p10 = pnand %p1402_p9, %p1396_p6 }
  0x41   :  { %1154 = vmatprep.subr.mxu1 %v133_v11  ;;  %v141_v21 = vmul.f32 %v1503_v13, %v140_v19  ;;  %v142_v22 = vmul.f32 %v1508_v14, %v140_v19  ;;  %v143_v25 = vmul.f32 %v1510_v15, %v140_v19  ;;  %v144_v33 = vmul.f32 %v1525_v26, %v140_v19  ;;  %v293_v62 = vld [vmem:[#allocation9 + $0x28] sm:$0xff]  ;;  %v292_v63 = vld [vmem:[#allocation9 + $0x20] sm:$0xff]  ;;  %v291_v0 = vld [vmem:[#allocation9 + $0x18] sm:$0xff] }
  0x42   :  { %1155 = vmatpush3.msra.mxu1 %v133_v11  ;;  %v145_v36 = vmul.f32 %v1530_v29, %v140_v19  ;;  %v1542_v37 = vsel %vm111_vm6, 1.0, %v1432_v12  ;;  %v1546_v40 = vsel %vm112_vm7, 1.0, %v1432_v12  ;;  %vm113_vm8 = vcmp.eq.s32.totalorder %v103_v30, %v1495_v5  ;;  %v290_v1 = vld [vmem:[#allocation9 + $0x10] sm:$0xff]  ;;  %v289_v2 = vld [vmem:[#allocation9 + $0x8] sm:$0xff]  ;;  %v288_v3 = vld [vmem:[#allocation9] sm:$0xff] }
  0x43   :  { %1156 = vmatprep.subr.mxu1 %v132_v17  ;;  %v149_v27 = vadd.f32 %v141_v21, %v1514_v18  ;;  %v150_v32 = vadd.f32 %v142_v22, %v1520_v24  ;;  %v151_v34 = vadd.f32 %v143_v25, %v1528_v28  ;;  %v152_v42 = vadd.f32 %v144_v33, %v1539_v35 }
  0x44   :  { %1157 = vmatpush3.msra.mxu1 %v132_v17  ;;  %v146_v43 = vmul.f32 %v1542_v37, %v140_v19  ;;  %v153_v44 = vadd.f32 %v145_v36, %v1544_v39  ;;  %v147_v46 = vmul.f32 %v1546_v40, %v140_v19  ;;  %v1557_v47 = vsel %vm113_vm8, 1.0, %v1432_v12  ;;  %v1573_v17 = vld [vmem:[#allocation10] sm:$0xff] }
  0x45   :  { %1158 = vmatprep.subr.mxu1 %v131_v23  ;;  %1162 = vmatprep.mubr.msk.f32.mxu1 %vm157_vm5, %v149_v27  ;;  %v148_v52 = vmul.f32 %v1557_v47, %v140_v19  ;;  %v306_v16 = vsub.s32 0, %v1493_v4  ;;  %v1592_v36 = vstv %s576_s16 }
  0x46   :  { %1159 = vmatpush3.msra.mxu1 %v131_v23  ;;  %v154_v51 = vadd.f32 %v146_v43, %v1554_v45  ;;  %v155_v53 = vadd.f32 %v147_v46, %v1559_v49 }
  0x47   :  { %1160 = vmatprep.subr.mxu1 %v130_v31  ;;  %v156_v57 = vadd.f32 %v148_v52, %v1566_v54  ;;  %v307_v19 = vrot.slane %v1573_v17, %v306_v16 }
  0x48   :  { %1161 = vmatpush3.msra.mxu1 %v130_v31 }
  0x49   :  { %1163 = vmatmul.mubr.msk.f32.vlgmr.msra.gmra.mxu1 %vm157_vm5, %v150_v32  ;;  %1174 = vmatprep.subr.mxu1 %v303_v38 }
  0x4a   :  { %1165 = vmatprep.mubr.msk.f32.mxu1 %vm157_vm5, %v151_v34  ;;  %1175 = vmatpush3.msra.mxu1 %v303_v38 }
  0x4b   :  { %1176 = vmatprep.subr.mxu1 %v302_v41 }
  0x4c   :  { %1177 = vmatpush3.msra.mxu1 %v302_v41  ;;  %v578_v41 = vmul.f32 %v1503_v13, %v1592_v36 }
  0x4d   :  { %1166 = vmatmul.mubr.msk.f32.gmra.mxu1 %vm157_vm5, %v152_v42  ;;  %1178 = vmatprep.subr.mxu1 %v301_v48 }
  0x4e   :  { %1168 = vmatprep.mubr.msk.f32.mxu1 %vm157_vm5, %v153_v44  ;;  %1179 = vmatpush3.msra.mxu1 %v301_v48 }
  0x4f   :  { %1180 = vmatprep.subr.mxu1 %v300_v50 }
  0x50   :  { %1181 = vmatpush3.msra.mxu1 %v300_v50  ;;  %v586_v50 = vadd.f32 %v578_v41, %v1514_v18 }
  0x51   :  { %1169 = vmatmul.mubr.msk.f32.gmra.mxu1 %vm157_vm5, %v154_v51  ;;  %1182 = vmatprep.subr.mxu1 %v299_v55 }
  0x52   :  { %1171 = vmatprep.mubr.msk.f32.mxu1 %vm157_vm5, %v155_v53  ;;  %1183 = vmatpush3.msra.mxu1 %v299_v55 }
  0x53   :  { %1184 = vmatprep.subr.mxu1 %v298_v56  ;;  %1234 = vmatprep.mubr.msk.f32.mxu0 %vm157_vm5, %v586_v50 }
  0x54   :  { %1185 = vmatpush3.msra.mxu1 %v298_v56 }
  0x55   :  { %1172 = vmatmul.mubr.msk.f32.gmra.mxu1 %vm157_vm5, %v156_v57  ;;  %1186 = vmatprep.subr.mxu1 %v297_v58 }
  0x56   :  { %1187 = vmatpush3.msra.mxu1 %v297_v58 }
  0x57   :  { %1188 = vmatprep.subr.mxu1 %v296_v59 }
  0x58   :  { %1189 = vmatpush3.msra.mxu1 %v296_v59 }
  0x59   :  { %1190 = vmatprep.subr.mxu1 %v295_v60 }
  0x5a   :  { %1191 = vmatpush3.msra.mxu1 %v295_v60 }
  0x5b   :  { %1192 = vmatprep.subr.mxu1 %v294_v61 }
  0x5c   :  { %1193 = vmatpush3.msra.mxu1 %v294_v61 }
  0x5d   :  { %1194 = vmatprep.subr.mxu1 %v293_v62 }
  0x5e   :  { %1195 = vmatpush3.msra.mxu1 %v293_v62 }
  0x5f   :  { %1196 = vmatprep.subr.mxu1 %v292_v63 }
  0x60   :  { %1197 = vmatpush3.msra.mxu1 %v292_v63 }
  0x61   :  { %1198 = vmatprep.subr.mxu1 %v291_v0 }
  0x62   :  { %1199 = vmatpush3.msra.mxu1 %v291_v0 }
  0x63   :  { %1200 = vmatprep.subr.mxu1 %v290_v1 }
  0x64   :  { %1201 = vmatpush3.msra.mxu1 %v290_v1 }
  0x65   :  { %1202 = vmatprep.subr.mxu1 %v289_v2 }
  0x66   :  { %1203 = vmatpush3.msra.mxu1 %v289_v2 }
  0x67   :  { %1204 = vmatprep.subr.mxu1 %v288_v3 }
  0x68   :  { %1205 = vmatpush3.msra.mxu1 %v288_v3 }
 0x109   :  { %v1164_v5 = vpop.f32.mrf.mxu1 }
 0x10b   :  { %v248_v6 = vpop.f32.mrf.mxu1 }
 0x10c   :  { %1206 = vmatprep.mubr.f32.mxu1 %v248_v6 }
 0x10d   :  { %v1167_v7 = vpop.f32.mrf.mxu1  ;;  %1207 = vmatmul.mubr.f32.vlgmr.msra.gmra.mxu1 %v1164_v5 }
 0x10f   :  { %v258_v8 = vpop.f32.mrf.mxu1 }
 0x110   :  { %1209 = vmatprep.mubr.f32.mxu1 %v258_v8 }
 0x111   :  { %v1170_v9 = vpop.f32.mrf.mxu1  ;;  %1210 = vmatmul.mubr.f32.gmra.mxu1 %v1167_v7 }
 0x113   :  { %v268_v10 = vpop.f32.mrf.mxu1 }
 0x114   :  { %1212 = vmatprep.mubr.f32.mxu1 %v268_v10 }
 0x115   :  { %v1173_v11 = vpop.f32.mrf.mxu1  ;;  %1213 = vmatmul.mubr.f32.gmra.mxu1 %v1170_v9 }
 0x117   :  { %v278_v12 = vpop.f32.mrf.mxu1 }
 0x118   :  { %1215 = vmatprep.mubr.f32.mxu1 %v278_v12 }
 0x119   :  { %1216 = vmatmul.mubr.f32.gmra.mxu1 %v1173_v11 }
 0x1cd   :  { %v1208_v20 = vpop.f32.mrf.mxu1 }
 0x1ce   :  { %v1578_v21 = vadd.f32 %v1208_v20, %v307_v19 }
 0x1cf   :  { %v374_v22 = vpop.f32.mrf.mxu1 }
 0x1d0   :  { %v1580_v23 = vadd.f32 %v374_v22, %v307_v19  ;;  %v427_v30 = vmul.f32 %v1578_v21, %v1578_v21 }
 0x1d1   :  { %v1211_v25 = vpop.f32.mrf.mxu1 }
 0x1d2   :  { %v426_v27 = vmul.f32 %v1580_v23, %v1580_v23  ;;  %v413_v32 = vadd.f32 %v1578_v21, %v1580_v23  ;;  %v1588_v33 = vadd.f32 %v1211_v25, %v307_v19 }
 0x1d3   :  { %v384_v31 = vpop.f32.mrf.mxu1 }
 0x1d4   :  { %v1590_v34 = vadd.f32 %v384_v31, %v307_v19  ;;  %v434_v42 = vadd.f32 %v427_v30, %v426_v27  ;;  %v429_v51 = vmul.f32 %v1588_v33, %v1588_v33 }
 0x1d5   :  { %v1214_v38 = vpop.f32.mrf.mxu1 }
 0x1d6   :  { %v414_v43 = vadd.f32 %v413_v32, %v1590_v34  ;;  %v428_v44 = vmul.f32 %v1590_v34, %v1590_v34  ;;  %v400_v46 = vadd.f32 %v1214_v38, %v307_v19 }
 0x1d7   :  { %v394_v48 = vpop.f32.mrf.mxu1 }
 0x1d8   :  { %v435_v52 = vadd.f32 %v434_v42, %v428_v44  ;;  %v395_v53 = vadd.f32 %v394_v48, %v307_v19  ;;  %v415_v55 = vadd.f32 %v414_v43, %v1588_v33  ;;  %v431_v59 = vmul.f32 %v400_v46, %v400_v46 }
 0x1d9   :  { %v1217_v56 = vpop.f32.mrf.mxu1  ;;  %v476_v44 = vsub.s32 2, %v1493_v4  ;;  %v464_v48 = vsub.s32 1, %v1493_v4 }
 0x1da   :  { %v416_v13 = vadd.f32 %v415_v55, %v395_v53  ;;  %v430_v57 = vmul.f32 %v395_v53, %v395_v53  ;;  %v436_v58 = vadd.f32 %v435_v52, %v429_v51  ;;  %v410_v62 = vadd.f32 %v1217_v56, %v307_v19 }
 0x1db   :  { %v404_v60 = vpop.f32.mrf.mxu1  ;;  %v477_v55 = vrot.slane %v1573_v17, %v476_v44 }
 0x1dc   :  { %v437_v61 = vadd.f32 %v436_v58, %v430_v57  ;;  %v405_v63 = vadd.f32 %v404_v60, %v307_v19  ;;  %v417_v0 = vadd.f32 %v416_v13, %v400_v46  ;;  %v433_v3 = vmul.f32 %v410_v62, %v410_v62 }
 0x1de   :  { %v418_v18 = vadd.f32 %v417_v0, %v405_v63  ;;  %v432_v1 = vmul.f32 %v405_v63, %v405_v63  ;;  %v438_v2 = vadd.f32 %v437_v61, %v431_v59 }
 0x1e0   :  { %v419_v5 = vadd.f32 %v418_v18, %v410_v62  ;;  %v439_v6 = vadd.f32 %v438_v2, %v432_v1 }
 0x1e2   :  { %v420_v7 = vrot.slane %v419_v5, 4  ;;  %v440_v8 = vadd.f32 %v439_v6, %v433_v3 }
 0x1e4   :  { %v421_v9 = vadd.f32 %v420_v7, %v419_v5  ;;  %v441_v10 = vrot.slane %v440_v8, 4 }
 0x1e6   :  { %v422_v11 = vrot.slane %v421_v9, 2  ;;  %v442_v12 = vadd.f32 %v441_v10, %v440_v8 }
 0x1e8   :  { %v423_v20 = vadd.f32 %v422_v11, %v421_v9  ;;  %v443_v22 = vrot.slane %v442_v12, 2 }
 0x1ea   :  { %v424_v25 = vrot.slane %v423_v20, 1  ;;  %v444_v27 = vadd.f32 %v443_v22, %v442_v12 }
 0x1ec   :  { %v425_v30 = vadd.f32 %v424_v25, %v423_v20  ;;  %v445_v31 = vrot.slane %v444_v27, 1 }
 0x1ee   :  { %v446_v19 = vadd.f32 %v445_v31, %v444_v27  ;;  %v447_v32 = vmul.f32 0.015625, %v425_v30 }
 0x1f0   :  { %v448_v38 = vmul.f32 0.015625, %v446_v19  ;;  %v449_v41 = vmul.f32 %v447_v32, %v447_v32  ;;  %v454_v52 = vsub.f32 %v1580_v23, %v447_v32  ;;  %v455_v56 = vsub.f32 %v1578_v21, %v447_v32 }
 0x1f1   :  { %v456_v13 = vsub.f32 %v1590_v34, %v447_v32  ;;  %v457_v57 = vsub.f32 %v1588_v33, %v447_v32  ;;  %v458_v59 = vsub.f32 %v395_v53, %v447_v32  ;;  %v459_v60 = vsub.f32 %v400_v46, %v447_v32 }
 0x1f2   :  { %v450_v42 = vsub.f32 %v448_v38, %v449_v41  ;;  %v460_v23 = vsub.f32 %v405_v63, %v447_v32  ;;  %v461_v34 = vsub.f32 %v410_v62, %v447_v32 }
 0x1f4   :  { %v451_v43 = vadd.f32 1e-05, %v450_v42 }
 0x1f6   :  { %1299 = vrsqrt.f32 %v451_v43 }
 0x203   :  { %v1300_v50 = vpop.eup %1299 }
 0x204   :  { %v453_v51 = vmul.f32 %v1300_v50, %v1573_v17 }
 0x206   :  { %v465_v58 = vrot.slane %v453_v51, %v464_v48 }
 0x208   :  { %v466_v61 = vmul.f32 %v465_v58, %v454_v52  ;;  %v467_v0 = vmul.f32 %v465_v58, %v455_v56  ;;  %v468_v18 = vmul.f32 %v465_v58, %v456_v13  ;;  %v469_v1 = vmul.f32 %v465_v58, %v457_v57 }
 0x209   :  { %v470_v2 = vmul.f32 %v465_v58, %v458_v59  ;;  %v471_v3 = vmul.f32 %v465_v58, %v459_v60  ;;  %v472_v8 = vmul.f32 %v465_v58, %v460_v23  ;;  %v473_v11 = vmul.f32 %v465_v58, %v461_v34 }
 0x20a   :  { %v478_v5 = vadd.f32 %v477_v55, %v466_v61  ;;  %v479_v6 = vadd.f32 %v477_v55, %v467_v0  ;;  %v480_v7 = vadd.f32 %v477_v55, %v468_v18  ;;  %v481_v21 = vadd.f32 %v477_v55, %v469_v1 }
 0x20b   :  { %v482_v9 = vadd.f32 %v477_v55, %v470_v2  ;;  %v483_v46 = vadd.f32 %v477_v55, %v471_v3  ;;  %v484_v22 = vadd.f32 %v477_v55, %v472_v8  ;;  %v485_v19 = vadd.f32 %v477_v55, %v473_v11 }
 0x20c   :  { %v1616_v33 = vmax.f32 %v478_v5, 0.0  ;;  %v1618_v10 = vmax.f32 %v479_v6, 0.0  ;;  %v1620_v53 = vmax.f32 %v480_v7, 0.0  ;;  %v1622_v12 = vmax.f32 %v481_v21, 0.0 }
 0x20d   :  { %v490_v25 = vmax.f32 %v482_v9, 0.0  ;;  %v491_v32 = vmax.f32 %v483_v46, 0.0  ;;  %v492_v43 = vmax.f32 %v484_v22, 0.0  ;;  %v493_v58 = vmax.f32 %v485_v19, 0.0 }
 0x20e   :  { %v494_v63 = vadd.f32 %v1618_v10, %v1616_v33  ;;  %v507_v20 = vmul.f32 %v1616_v33, %v1616_v33  ;;  %v508_v62 = vmul.f32 %v1618_v10, %v1618_v10  ;;  %v509_v30 = vmul.f32 %v1620_v53, %v1620_v53 }
 0x20f   :  { %v510_v41 = vmul.f32 %v1622_v12, %v1622_v12  ;;  %v511_v51 = vmul.f32 %v490_v25, %v490_v25  ;;  %v512_v13 = vmul.f32 %v491_v32, %v491_v32  ;;  %v513_v60 = vmul.f32 %v492_v43, %v492_v43 }
 0x210   :  { %v495_v27 = vadd.f32 %v494_v63, %v1620_v53  ;;  %v515_v31 = vadd.f32 %v508_v62, %v507_v20  ;;  %v514_v18 = vmul.f32 %v493_v58, %v493_v58 }
 0x212   :  { %v496_v38 = vadd.f32 %v495_v27, %v1622_v12  ;;  %v516_v42 = vadd.f32 %v515_v31, %v509_v30  ;;  %v557_v30 = vsub.s32 4, %v1493_v4  ;;  %v545_v31 = vsub.s32 3, %v1493_v4 }
 0x214   :  { %v497_v50 = vadd.f32 %v496_v38, %v490_v25  ;;  %v517_v52 = vadd.f32 %v516_v42, %v510_v41  ;;  %v558_v41 = vrot.slane %v1573_v17, %v557_v30 }
 0x216   :  { %v498_v56 = vadd.f32 %v497_v50, %v491_v32  ;;  %v518_v57 = vadd.f32 %v517_v52, %v511_v51 }
 0x218   :  { %v499_v59 = vadd.f32 %v498_v56, %v492_v43  ;;  %v519_v61 = vadd.f32 %v518_v57, %v512_v13 }
 0x21a   :  { %v520_v0 = vadd.f32 %v519_v61, %v513_v60  ;;  %v500_v55 = vadd.f32 %v499_v59, %v493_v58 }
 0x21c   :  { %v501_v1 = vrot.slane %v500_v55, 4  ;;  %v521_v23 = vadd.f32 %v520_v0, %v514_v18 }
 0x21e   :  { %v502_v2 = vadd.f32 %v501_v1, %v500_v55  ;;  %v522_v3 = vrot.slane %v521_v23, 4 }
 0x220   :  { %v503_v5 = vrot.slane %v502_v2, 2  ;;  %v523_v6 = vadd.f32 %v522_v3, %v521_v23 }
 0x222   :  { %v504_v7 = vadd.f32 %v503_v5, %v502_v2  ;;  %v524_v21 = vrot.slane %v523_v6, 2 }
 0x224   :  { %v505_v8 = vrot.slane %v504_v7, 1  ;;  %v525_v34 = vadd.f32 %v524_v21, %v523_v6 }
 0x226   :  { %v506_v9 = vadd.f32 %v505_v8, %v504_v7  ;;  %v526_v46 = vrot.slane %v525_v34, 1 }
 0x228   :  { %v527_v11 = vadd.f32 %v526_v46, %v525_v34  ;;  %v528_v63 = vmul.f32 0.015625, %v506_v9  ;;  %v579_v9 = vmul.f32 %v1508_v14, %v1592_v36  ;;  %v582_v14 = vmul.f32 %v1530_v29, %v1592_v36  ;;  %v739_v29 = vld [vmem:[#allocation9 + $0xe8] sm:$0xff] }
 0x22a   :  { %v529_v20 = vmul.f32 0.015625, %v527_v11  ;;  %v530_v62 = vmul.f32 %v528_v63, %v528_v63  ;;  %v542_v42 = vsub.f32 %v493_v58, %v528_v63  ;;  %v541_v51 = vsub.f32 %v492_v43, %v528_v63 }
 0x22b   :  { %v540_v52 = vsub.f32 %v491_v32, %v528_v63  ;;  %v539_v59 = vsub.f32 %v490_v25, %v528_v63  ;;  %v538_v55 = vsub.f32 %v1622_v12, %v528_v63  ;;  %v536_v32 = vsub.f32 %v1618_v10, %v528_v63 }
 0x22c   :  { %v531_v22 = vsub.f32 %v529_v20, %v530_v62  ;;  %v535_v6 = vsub.f32 %v1616_v33, %v528_v63  ;;  %v580_v33 = vmul.f32 %v1510_v15, %v1592_v36  ;;  %v581_v20 = vmul.f32 %v1525_v26, %v1592_v36  ;;  %v740_v15 = vld [vmem:[#allocation9 + $0xf0] sm:$0xff] }
 0x22d   :  { %v590_v26 = vadd.f32 %v582_v14, %v1544_v39 }
 0x22e   :  { %v532_v27 = vadd.f32 1e-05, %v531_v22  ;;  %v588_v62 = vadd.f32 %v580_v33, %v1528_v28  ;;  %v741_v22 = vld [vmem:[#allocation9 + $0xf8] sm:$0xff]  ;;  %v584_v28 = vmul.f32 %v1546_v40, %v1592_v36  ;;  %v736_v40 = vld [vmem:[#allocation9 + $0xd0] sm:$0xff] }
 0x230   :  { %1301 = vrsqrt.f32 %v532_v27  ;;  %v589_v27 = vadd.f32 %v581_v20, %v1539_v35  ;;  %v592_v39 = vadd.f32 %v584_v28, %v1559_v49  ;;  %v733_v49 = vld [vmem:[#allocation9 + $0xb8] sm:$0xff] }
 0x23d   :  { %v1302_v19 = vpop.eup %1301 }
 0x23e   :  { %v534_v38 = vmul.f32 %v1302_v19, %v1573_v17  ;;  %v537_v17 = vsub.f32 %v1620_v53, %v528_v63  ;;  %v587_v63 = vadd.f32 %v579_v9, %v1520_v24  ;;  %v583_v24 = vmul.f32 %v1542_v37, %v1592_v36  ;;  %v738_v19 = vld [vmem:[#allocation9 + $0xe0] sm:$0xff] }
 0x23f   :  { %v585_v37 = vmul.f32 %v1557_v47, %v1592_v36  ;;  %v734_v47 = vld [vmem:[#allocation9 + $0xc0] sm:$0xff]  ;;  %v732_v36 = vld [vmem:[#allocation9 + $0xb0] sm:$0xff] }
 0x240   :  { %v546_v50 = vrot.slane %v534_v38, %v545_v31  ;;  %v591_v35 = vadd.f32 %v583_v24, %v1554_v45  ;;  %v737_v38 = vld [vmem:[#allocation9 + $0xd8] sm:$0xff]  ;;  %v735_v45 = vld [vmem:[#allocation9 + $0xc8] sm:$0xff] }
 0x242   :  { %v554_v56 = vmul.f32 %v546_v50, %v542_v42  ;;  %v553_v13 = vmul.f32 %v546_v50, %v541_v51  ;;  %v552_v57 = vmul.f32 %v546_v50, %v540_v52  ;;  %v551_v0 = vmul.f32 %v546_v50, %v539_v59  ;;  %v731_v42 = vld [vmem:[#allocation9 + $0xa8] sm:$0xff]  ;;  %v728_v51 = vld [vmem:[#allocation9 + $0x90] sm:$0xff] }
 0x243   :  { %v550_v23 = vmul.f32 %v546_v50, %v538_v55  ;;  %v549_v3 = vmul.f32 %v546_v50, %v537_v17  ;;  %v548_v5 = vmul.f32 %v546_v50, %v536_v32  ;;  %v547_v21 = vmul.f32 %v546_v50, %v535_v6  ;;  %v729_v50 = vld [vmem:[#allocation9 + $0x98] sm:$0xff]  ;;  %v727_v52 = vld [vmem:[#allocation9 + $0x88] sm:$0xff] }
 0x244   :  { %v566_v60 = vadd.f32 %v558_v41, %v554_v56  ;;  %v565_v61 = vadd.f32 %v558_v41, %v553_v13  ;;  %v564_v1 = vadd.f32 %v558_v41, %v552_v57  ;;  %v563_v2 = vadd.f32 %v558_v41, %v551_v0  ;;  %v726_v56 = vld [vmem:[#allocation9 + $0x80] sm:$0xff] }
 0x245   :  { %v562_v25 = vadd.f32 %v558_v41, %v550_v23  ;;  %v561_v7 = vadd.f32 %v558_v41, %v549_v3  ;;  %v560_v8 = vadd.f32 %v558_v41, %v548_v5  ;;  %v559_v10 = vadd.f32 %v558_v41, %v547_v21 }
 0x246   :  { %v574_v18 = vmax.f32 %v566_v60, 0.0  ;;  %v573_v58 = vmax.f32 %v565_v61, 0.0  ;;  %v572_v43 = vmax.f32 %v564_v1, 0.0  ;;  %v571_v12 = vmax.f32 %v563_v2, 0.0  ;;  %v1676_v1 = vld [vmem:[#allocation10 + $0x8] sm:$0xff] }
 0x247   :  { %v570_v53 = vmax.f32 %v562_v25, 0.0  ;;  %v569_v34 = vmax.f32 %v561_v7, 0.0  ;;  %v568_v46 = vmax.f32 %v560_v8, 0.0  ;;  %v567_v11 = vmax.f32 %v559_v10, 0.0 }
 0x248   :  { %1218 = vmatprep.subr.mxu0 %v574_v18  ;;  %v593_v41 = vadd.f32 %v585_v37, %v1566_v54  ;;  %v730_v54 = vld [vmem:[#allocation9 + $0xa0] sm:$0xff]  ;;  %v745_v23 = vrot.slane %v1676_v1, %v306_v16 }
 0x249   :  { %1219 = vmatpush3.msra.mxu0 %v574_v18 }
 0x24a   :  { %1220 = vmatprep.subr.mxu0 %v573_v58 }
 0x24b   :  { %1221 = vmatpush3.msra.mxu0 %v573_v58 }
 0x24c   :  { %1222 = vmatprep.subr.mxu0 %v572_v43 }
 0x24d   :  { %1223 = vmatpush3.msra.mxu0 %v572_v43 }
 0x24e   :  { %1224 = vmatprep.subr.mxu0 %v571_v12 }
 0x24f   :  { %1225 = vmatpush3.msra.mxu0 %v571_v12 }
 0x250   :  { %1226 = vmatprep.subr.mxu0 %v570_v53 }
 0x251   :  { %1227 = vmatpush3.msra.mxu0 %v570_v53 }
 0x252   :  { %1228 = vmatprep.subr.mxu0 %v569_v34 }
 0x253   :  { %1229 = vmatpush3.msra.mxu0 %v569_v34 }
 0x254   :  { %1230 = vmatprep.subr.mxu0 %v568_v46 }
 0x255   :  { %1231 = vmatpush3.msra.mxu0 %v568_v46 }
 0x256   :  { %1232 = vmatprep.subr.mxu0 %v567_v11 }
 0x257   :  { %1233 = vmatpush3.msra.mxu0 %v567_v11 }
 0x258   :  { %1235 = vmatmul.mubr.msk.f32.vlgmr.msra.gmra.mxu0 %vm157_vm5, %v587_v63  ;;  %1246 = vmatprep.subr.mxu0 %v741_v22 }
 0x259   :  { %1237 = vmatprep.mubr.msk.f32.mxu0 %vm157_vm5, %v588_v62  ;;  %1247 = vmatpush3.msra.mxu0 %v741_v22 }
 0x25a   :  { %1248 = vmatprep.subr.mxu0 %v740_v15 }
 0x25b   :  { %1249 = vmatpush3.msra.mxu0 %v740_v15 }
 0x25c   :  { %1238 = vmatmul.mubr.msk.f32.gmra.mxu0 %vm157_vm5, %v589_v27  ;;  %1250 = vmatprep.subr.mxu0 %v739_v29 }
 0x25d   :  { %1240 = vmatprep.mubr.msk.f32.mxu0 %vm157_vm5, %v590_v26  ;;  %1251 = vmatpush3.msra.mxu0 %v739_v29 }
 0x25e   :  { %1252 = vmatprep.subr.mxu0 %v738_v19 }
 0x25f   :  { %1253 = vmatpush3.msra.mxu0 %v738_v19 }
 0x260   :  { %1241 = vmatmul.mubr.msk.f32.gmra.mxu0 %vm157_vm5, %v591_v35  ;;  %1254 = vmatprep.subr.mxu0 %v737_v38 }
 0x261   :  { %1243 = vmatprep.mubr.msk.f32.mxu0 %vm157_vm5, %v592_v39  ;;  %1255 = vmatpush3.msra.mxu0 %v737_v38 }
 0x262   :  { %1256 = vmatprep.subr.mxu0 %v736_v40 }
 0x263   :  { %1257 = vmatpush3.msra.mxu0 %v736_v40 }
 0x264   :  { %1244 = vmatmul.mubr.msk.f32.gmra.mxu0 %vm157_vm5, %v593_v41  ;;  %1258 = vmatprep.subr.mxu0 %v735_v45 }
 0x265   :  { %1259 = vmatpush3.msra.mxu0 %v735_v45 }
 0x266   :  { %1260 = vmatprep.subr.mxu0 %v734_v47 }
 0x267   :  { %1261 = vmatpush3.msra.mxu0 %v734_v47 }
 0x268   :  { %1262 = vmatprep.subr.mxu0 %v733_v49 }
 0x269   :  { %1263 = vmatpush3.msra.mxu0 %v733_v49 }
 0x26a   :  { %1264 = vmatprep.subr.mxu0 %v732_v36 }
 0x26b   :  { %1265 = vmatpush3.msra.mxu0 %v732_v36 }
 0x26c   :  { %1266 = vmatprep.subr.mxu0 %v731_v42 }
 0x26d   :  { %1267 = vmatpush3.msra.mxu0 %v731_v42 }
 0x26e   :  { %1268 = vmatprep.subr.mxu0 %v730_v54 }
 0x26f   :  { %1269 = vmatpush3.msra.mxu0 %v730_v54 }
 0x270   :  { %1270 = vmatprep.subr.mxu0 %v729_v50 }
 0x271   :  { %1271 = vmatpush3.msra.mxu0 %v729_v50 }
 0x272   :  { %1272 = vmatprep.subr.mxu0 %v728_v51 }
 0x273   :  { %1273 = vmatpush3.msra.mxu0 %v728_v51 }
 0x274   :  { %1274 = vmatprep.subr.mxu0 %v727_v52 }
 0x275   :  { %1275 = vmatpush3.msra.mxu0 %v727_v52 }
 0x276   :  { %1276 = vmatprep.subr.mxu0 %v726_v56 }
 0x277   :  { %1277 = vmatpush3.msra.mxu0 %v726_v56 }
 0x318   :  { %v1236_v13 = vpop.f32.mrf.mxu0 }
 0x31a   :  { %v684_v57 = vpop.f32.mrf.mxu0 }
 0x31b   :  { %1278 = vmatprep.mubr.f32.mxu0 %v684_v57 }
 0x31c   :  { %v1239_v59 = vpop.f32.mrf.mxu0  ;;  %1279 = vmatmul.mubr.f32.vlgmr.msra.gmra.mxu0 %v1236_v13 }
 0x31e   :  { %v694_v60 = vpop.f32.mrf.mxu0 }
 0x31f   :  { %1281 = vmatprep.mubr.f32.mxu0 %v694_v60 }
 0x320   :  { %v1242_v61 = vpop.f32.mrf.mxu0  ;;  %1282 = vmatmul.mubr.f32.gmra.mxu0 %v1239_v59 }
 0x322   :  { %v704_v0 = vpop.f32.mrf.mxu0 }
 0x323   :  { %1284 = vmatprep.mubr.f32.mxu0 %v704_v0 }
 0x324   :  { %v1245_v55 = vpop.f32.mrf.mxu0  ;;  %1285 = vmatmul.mubr.f32.gmra.mxu0 %v1242_v61 }
 0x326   :  { %v714_v18 = vpop.f32.mrf.mxu0 }
 0x327   :  { %1287 = vmatprep.mubr.f32.mxu0 %v714_v18 }
 0x328   :  { %1288 = vmatmul.mubr.f32.gmra.mxu0 %v1245_v55 }
 0x3dc   :  { %v1280_v17 = vpop.f32.mrf.mxu0 }
 0x3dd   :  { %v1681_v2 = vadd.f32 %v1280_v17, %v745_v23  ;;  %v915_v17 = vrot.slane %v1676_v1, %v476_v44 }
 0x3de   :  { %v812_v58 = vpop.f32.mrf.mxu0 }
 0x3df   :  { %v1683_v3 = vadd.f32 %v812_v58, %v745_v23  ;;  %v865_v5 = vmul.f32 %v1681_v2, %v1681_v2 }
 0x3e0   :  { %v1283_v32 = vpop.f32.mrf.mxu0 }
 0x3e1   :  { %v864_v43 = vmul.f32 %v1683_v3, %v1683_v3  ;;  %v851_v6 = vadd.f32 %v1681_v2, %v1683_v3  ;;  %v828_v12 = vadd.f32 %v1283_v32, %v745_v23 }
 0x3e2   :  { %v822_v25 = vpop.f32.mrf.mxu0 }
 0x3e3   :  { %v823_v7 = vadd.f32 %v822_v25, %v745_v23  ;;  %v872_v21 = vadd.f32 %v865_v5, %v864_v43  ;;  %v867_v9 = vmul.f32 %v828_v12, %v828_v12 }
 0x3e4   :  { %v1286_v16 = vpop.f32.mrf.mxu0 }
 0x3e5   :  { %v852_v53 = vadd.f32 %v851_v6, %v823_v7  ;;  %v866_v8 = vmul.f32 %v823_v7, %v823_v7  ;;  %v838_v34 = vadd.f32 %v1286_v16, %v745_v23 }
 0x3e6   :  { %v832_v10 = vpop.f32.mrf.mxu0 }
 0x3e7   :  { %v873_v33 = vadd.f32 %v872_v21, %v866_v8  ;;  %v833_v46 = vadd.f32 %v832_v10, %v745_v23  ;;  %v853_v11 = vadd.f32 %v852_v53, %v828_v12  ;;  %v869_v22 = vmul.f32 %v838_v34, %v838_v34 }
 0x3e8   :  { %v1289_v63 = vpop.f32.mrf.mxu0 }
 0x3e9   :  { %v854_v20 = vadd.f32 %v853_v11, %v833_v46  ;;  %v868_v62 = vmul.f32 %v833_v46, %v833_v46  ;;  %v874_v14 = vadd.f32 %v873_v33, %v867_v9  ;;  %v848_v24 = vadd.f32 %v1289_v63, %v745_v23 }
 0x3ea   :  { %v842_v15 = vpop.f32.mrf.mxu0 }
 0x3eb   :  { %v875_v27 = vadd.f32 %v874_v14, %v868_v62  ;;  %v843_v26 = vadd.f32 %v842_v15, %v745_v23  ;;  %v855_v28 = vadd.f32 %v854_v20, %v838_v34  ;;  %v871_v37 = vmul.f32 %v848_v24, %v848_v24 }
 0x3ed   :  { %v856_v29 = vadd.f32 %v855_v28, %v843_v26  ;;  %v870_v19 = vmul.f32 %v843_v26, %v843_v26  ;;  %v876_v35 = vadd.f32 %v875_v27, %v869_v22 }
 0x3ef   :  { %v857_v39 = vadd.f32 %v856_v29, %v848_v24  ;;  %v877_v38 = vadd.f32 %v876_v35, %v870_v19 }
 0x3f1   :  { %v858_v40 = vrot.slane %v857_v39, 4  ;;  %v878_v41 = vadd.f32 %v877_v38, %v871_v37 }
 0x3f3   :  { %v859_v45 = vadd.f32 %v858_v40, %v857_v39  ;;  %v879_v47 = vrot.slane %v878_v41, 4 }
 0x3f5   :  { %v860_v49 = vrot.slane %v859_v45, 2  ;;  %v880_v36 = vadd.f32 %v879_v47, %v878_v41 }
 0x3f7   :  { %v861_v42 = vadd.f32 %v860_v49, %v859_v45  ;;  %v881_v54 = vrot.slane %v880_v36, 2 }
 0x3f9   :  { %v862_v50 = vrot.slane %v861_v42, 1  ;;  %v882_v51 = vadd.f32 %v881_v54, %v880_v36 }
 0x3fb   :  { %v863_v52 = vadd.f32 %v862_v50, %v861_v42  ;;  %v883_v56 = vrot.slane %v882_v51, 1 }
 0x3fd   :  { %v884_v13 = vadd.f32 %v883_v56, %v882_v51  ;;  %v885_v57 = vmul.f32 0.015625, %v863_v52 }
 0x3ff   :  { %v886_v59 = vmul.f32 0.015625, %v884_v13  ;;  %v887_v60 = vmul.f32 %v885_v57, %v885_v57  ;;  %v892_v23 = vsub.f32 %v1683_v3, %v885_v57  ;;  %v893_v58 = vsub.f32 %v1681_v2, %v885_v57 }
 0x400   :  { %v894_v32 = vsub.f32 %v823_v7, %v885_v57  ;;  %v895_v43 = vsub.f32 %v828_v12, %v885_v57  ;;  %v896_v5 = vsub.f32 %v833_v46, %v885_v57  ;;  %v897_v6 = vsub.f32 %v838_v34, %v885_v57 }
 0x401   :  { %v888_v61 = vsub.f32 %v886_v59, %v887_v60  ;;  %v898_v10 = vsub.f32 %v843_v26, %v885_v57  ;;  %v899_v20 = vsub.f32 %v848_v24, %v885_v57 }
 0x403   :  { %v889_v0 = vadd.f32 1e-05, %v888_v61 }
 0x405   :  { %1303 = vrsqrt.f32 %v889_v0 }
 0x412   :  { %v1304_v55 = vpop.eup %1303 }
 0x413   :  { %v891_v18 = vmul.f32 %v1304_v55, %v1676_v1 }
 0x415   :  { %v903_v25 = vrot.slane %v891_v18, %v464_v48 }
 0x417   :  { %v904_v16 = vmul.f32 %v903_v25, %v892_v23  ;;  %v905_v21 = vmul.f32 %v903_v25, %v893_v58  ;;  %v906_v53 = vmul.f32 %v903_v25, %v894_v32  ;;  %v907_v8 = vmul.f32 %v903_v25, %v895_v43 }
 0x418   :  { %v908_v9 = vmul.f32 %v903_v25, %v896_v5  ;;  %v909_v3 = vmul.f32 %v903_v25, %v897_v6  ;;  %v910_v2 = vmul.f32 %v903_v25, %v898_v10  ;;  %v911_v34 = vmul.f32 %v903_v25, %v899_v20 }
 0x419   :  { %v916_v33 = vadd.f32 %v915_v17, %v904_v16  ;;  %v917_v11 = vadd.f32 %v915_v17, %v905_v21  ;;  %v918_v63 = vadd.f32 %v915_v17, %v906_v53  ;;  %v919_v44 = vadd.f32 %v915_v17, %v907_v8 }
 0x41a   :  { %v920_v7 = vadd.f32 %v915_v17, %v908_v9  ;;  %v921_v46 = vadd.f32 %v915_v17, %v909_v3  ;;  %v922_v24 = vadd.f32 %v915_v17, %v910_v2  ;;  %v923_v35 = vadd.f32 %v915_v17, %v911_v34 }
 0x41b   :  { %v1699_v12 = vmax.f32 %v916_v33, 0.0  ;;  %v1701_v62 = vmax.f32 %v917_v11, 0.0  ;;  %v1703_v48 = vmax.f32 %v918_v63, 0.0  ;;  %v1705_v14 = vmax.f32 %v919_v44, 0.0 }
 0x41c   :  { %v928_v26 = vmax.f32 %v920_v7, 0.0  ;;  %v929_v37 = vmax.f32 %v921_v46, 0.0  ;;  %v930_v41 = vmax.f32 %v922_v24, 0.0  ;;  %v931_v36 = vmax.f32 %v923_v35, 0.0 }
 0x41d   :  { %v932_v22 = vadd.f32 %v1701_v62, %v1699_v12  ;;  %v945_v15 = vmul.f32 %v1699_v12, %v1699_v12  ;;  %v946_v27 = vmul.f32 %v1701_v62, %v1701_v62  ;;  %v947_v29 = vmul.f32 %v1703_v48, %v1703_v48 }
 0x41e   :  { %v948_v38 = vmul.f32 %v1705_v14, %v1705_v14  ;;  %v949_v47 = vmul.f32 %v928_v26, %v928_v26  ;;  %v950_v54 = vmul.f32 %v929_v37, %v929_v37  ;;  %v951_v52 = vmul.f32 %v930_v41, %v930_v41 }
 0x41f   :  { %v933_v28 = vadd.f32 %v932_v22, %v1703_v48  ;;  %v953_v19 = vadd.f32 %v946_v27, %v945_v15  ;;  %v952_v57 = vmul.f32 %v931_v36, %v931_v36  ;;  %v996_v33 = vrot.slane %v1676_v1, %v557_v30 }
 0x421   :  { %v934_v39 = vadd.f32 %v933_v28, %v1705_v14  ;;  %v954_v40 = vadd.f32 %v953_v19, %v947_v29 }
 0x423   :  { %v935_v45 = vadd.f32 %v934_v39, %v928_v26  ;;  %v955_v49 = vadd.f32 %v954_v40, %v948_v38 }
 0x425   :  { %v936_v42 = vadd.f32 %v935_v45, %v929_v37  ;;  %v956_v50 = vadd.f32 %v955_v49, %v949_v47 }
 0x427   :  { %v937_v51 = vadd.f32 %v936_v42, %v930_v41  ;;  %v957_v56 = vadd.f32 %v956_v50, %v950_v54 }
 0x429   :  { %v938_v13 = vadd.f32 %v937_v51, %v931_v36  ;;  %v958_v59 = vadd.f32 %v957_v56, %v951_v52 }
 0x42b   :  { %v939_v60 = vrot.slane %v938_v13, 4  ;;  %v959_v61 = vadd.f32 %v958_v59, %v952_v57 }
 0x42d   :  { %v940_v0 = vadd.f32 %v939_v60, %v938_v13  ;;  %v960_v55 = vrot.slane %v959_v61, 4 }
 0x42f   :  { %v941_v18 = vrot.slane %v940_v0, 2  ;;  %v961_v23 = vadd.f32 %v960_v55, %v959_v61 }
 0x431   :  { %v942_v17 = vadd.f32 %v941_v18, %v940_v0  ;;  %v962_v58 = vrot.slane %v961_v23, 2 }
 0x433   :  { %v943_v32 = vrot.slane %v942_v17, 1  ;;  %v963_v43 = vadd.f32 %v962_v58, %v961_v23 }
 0x435   :  { %v944_v25 = vadd.f32 %v943_v32, %v942_v17  ;;  %v964_v5 = vrot.slane %v963_v43, 1 }
 0x437   :  { %v965_v6 = vadd.f32 %v964_v5, %v963_v43  ;;  %v966_v16 = vmul.f32 0.015625, %v944_v25 }
 0x439   :  { %v967_v21 = vmul.f32 0.015625, %v965_v6  ;;  %v968_v53 = vmul.f32 %v966_v16, %v966_v16  ;;  %v979_v11 = vsub.f32 %v930_v41, %v966_v16  ;;  %v973_v44 = vsub.f32 %v1699_v12, %v966_v16 }
 0x43a   :  { %v974_v20 = vsub.f32 %v1701_v62, %v966_v16  ;;  %v975_v2 = vsub.f32 %v1703_v48, %v966_v16  ;;  %v976_v7 = vsub.f32 %v1705_v14, %v966_v16  ;;  %v977_v34 = vsub.f32 %v928_v26, %v966_v16 }
 0x43b   :  { %v969_v8 = vsub.f32 %v967_v21, %v968_v53  ;;  %v978_v46 = vsub.f32 %v929_v37, %v966_v16  ;;  %v980_v22 = vsub.f32 %v931_v36, %v966_v16 }
 0x43d   :  { %v970_v10 = vadd.f32 1e-05, %v969_v8 }
 0x43f   :  { %1305 = vrsqrt.f32 %v970_v10 }
 0x44c   :  { %v1306_v9 = vpop.eup %1305 }
 0x44d   :  { %v972_v3 = vmul.f32 %v1306_v9, %v1676_v1 }
 0x44f   :  { %v984_v63 = vrot.slane %v972_v3, %v545_v31 }
 0x451   :  { %v991_v15 = vmul.f32 %v984_v63, %v979_v11  ;;  %v985_v27 = vmul.f32 %v984_v63, %v973_v44  ;;  %v986_v24 = vmul.f32 %v984_v63, %v974_v20  ;;  %v987_v28 = vmul.f32 %v984_v63, %v975_v2 }
 0x452   :  { %v988_v30 = vmul.f32 %v984_v63, %v976_v7  ;;  %v989_v1 = vmul.f32 %v984_v63, %v977_v34  ;;  %v990_v29 = vmul.f32 %v984_v63, %v978_v46  ;;  %v992_v4 = vmul.f32 %v984_v63, %v980_v22 }
 0x453   :  { %v1003_v31 = vadd.f32 %v996_v33, %v991_v15  ;;  %v997_v19 = vadd.f32 %v996_v33, %v985_v27  ;;  %v998_v12 = vadd.f32 %v996_v33, %v986_v24  ;;  %v999_v35 = vadd.f32 %v996_v33, %v987_v28 }
 0x454   :  { %v1000_v62 = vadd.f32 %v996_v33, %v988_v30  ;;  %v1001_v48 = vadd.f32 %v996_v33, %v989_v1  ;;  %v1002_v14 = vadd.f32 %v996_v33, %v990_v29  ;;  %v1004_v26 = vadd.f32 %v996_v33, %v992_v4 }
 0x455   :  { %v1011_v37 = vmax.f32 %v1003_v31, 0.0  ;;  %v1005_v39 = vmax.f32 %v997_v19, 0.0  ;;  %v1006_v38 = vmax.f32 %v998_v12, 0.0  ;;  %v1007_v40 = vmax.f32 %v999_v35, 0.0 }
 0x456   :  { %v1008_v41 = vmax.f32 %v1000_v62, 0.0  ;;  %v1009_v45 = vmax.f32 %v1001_v48, 0.0  ;;  %v1010_v47 = vmax.f32 %v1002_v14, 0.0  ;;  %v1012_v49 = vmax.f32 %v1004_v26, 0.0 }
 0x457   :  { %1019 = vst [vmem:[#allocation12 + $0x30] sm:$0xff] %v1011_v37  ;;  %1013 = vst [vmem:[#allocation12] sm:$0xff] %v1005_v39 }
 0x458   :  { %1014 = vst [vmem:[#allocation12 + $0x8] sm:$0xff] %v1006_v38  ;;  %1015 = vst [vmem:[#allocation12 + $0x10] sm:$0xff] %v1007_v40 }
 0x459   :  { %1016 = vst [vmem:[#allocation12 + $0x18] sm:$0xff] %v1008_v41  ;;  %1017 = vst [vmem:[#allocation12 + $0x20] sm:$0xff] %v1009_v45 }
 0x45a   :  { %1018 = vst [vmem:[#allocation12 + $0x28] sm:$0xff] %v1010_v47  ;;  %1020 = vst [vmem:[#allocation12 + $0x38] sm:$0xff] %v1012_v49 }
 0x45b   :  { %1406 = shalt.err (!%p1403_p10)
}
 0x45c   :  { %1032 = dma.vmem_to_hbm [thread:$0]  %s1027_s18, 1024, %s1740_s5, [#allocation4], %s1427_s23, %s1427_s23, %s1428_s24  }
 0x45d   :  { %1423 = dma.done.wait [#allocation4], 1024  }
 0x45e   :  { %1424 = vsyncadd [#allocation4], 4294966272 }
 0x45f   :  { %1036 = vsyncpa [#allocation3], 1 }
 0x460   :  { %1037 = vsyncpa [#allocation8], 1 }
 0x461   :  { %1038 = vsyncpa [#allocation11], 1 }
 0x462   :  { %1039 = vsyncpa [#allocation4], 1 }
 0x463   :  { %1040 = vsyncpa [#allocation5], 1 }

</bundles_post_ra>
